<compile_context>
chip_gen: v5e
topology: v5e:2x2
jax: 0.10.0
libtpu: 0.0.40
codegen_flags: <defaults>
</compile_context>

<pallas_src>
import functools

import jax
import jax.numpy as jnp
from jax.experimental import pallas as pl
from jax.experimental.pallas import tpu as pltpu


def _round_up(a, b):
    return (a + b - 1) // b * b


def _masked_linear_kernel(x_ref, w_ref, m_ref, b_ref, o_ref, acc_ref):
    """One (tm, tn) output tile; K-reduction over grid axis 2."""
    k = pl.program_id(2)

    @pl.when(k == 0)
    def _():
        acc_ref[...] = jnp.zeros_like(acc_ref)

    # Mask apply on the VPU (int8 -> f32 cast + multiply), then straight NN
    # matmul on the MXU -- no transpose anywhere in the kernel.
    w_masked = w_ref[...] * m_ref[...].astype(w_ref.dtype)          # [tk, tn]
    acc_ref[...] += jnp.dot(
        x_ref[...], w_masked, preferred_element_type=jnp.float32
    )                                                               # [tm, tn]

    @pl.when(k == pl.num_programs(2) - 1)
    def _():
        o_ref[...] = (acc_ref[...] + b_ref[...]).astype(o_ref.dtype)


@functools.partial(jax.jit, static_argnames=("tm", "tn", "tk"))
def masked_linear(x, weight, mask, bias=None, *, tm=256, tn=256, tk=512):
    """y = x @ (weight * mask.T).T + bias  ==  x @ (weight.T * mask) + bias

    x      : [batch, in_features]            float32
    weight : [out_features, in_features]     float32 (torch nn.Linear layout)
    mask   : [in_features, out_features]     bool / int
    bias   : [out_features] float32 or None
    """
    M, K = x.shape
    N, K2 = weight.shape
    assert K == K2, (K, K2)
    assert mask.shape == (K, N), mask.shape

    # One-time re-layout: weight -> [in, out] so it shares the mask's layout.
    w_io = weight.T                              # [K, N]
    mask_i8 = mask.astype(jnp.int8)              # [K, N], 1 B/elem HBM stream
    if bias is None:
        bias = jnp.zeros((N,), w_io.dtype)

    # Clamp tiles to (padded) problem dims while keeping (8, 128) alignment.
    tm = min(tm, _round_up(M, 8))
    tn = min(tn, _round_up(N, 128))
    tk = min(tk, _round_up(K, 128))
    Mp, Kp, Np = _round_up(M, tm), _round_up(K, tk), _round_up(N, tn)

    # Zero-pad up to tile multiples: padded K contributes 0 to the reduction;
    # padded M rows / N cols are sliced off below.
    x_p = jnp.pad(x, ((0, Mp - M), (0, Kp - K)))
    w_p = jnp.pad(w_io, ((0, Kp - K), (0, Np - N)))
    m_p = jnp.pad(mask_i8, ((0, Kp - K), (0, Np - N)))
    b_p = jnp.pad(bias, (0, Np - N)).reshape(1, Np)

    grid = (Mp // tm, Np // tn, Kp // tk)        # reduction axis last

    out_p = pl.pallas_call(
        _masked_linear_kernel,
        out_shape=jax.ShapeDtypeStruct((Mp, Np), x.dtype),
        grid_spec=pltpu.PrefetchScalarGridSpec(
            num_scalar_prefetch=0,
            grid=grid,
            in_specs=[
                pl.BlockSpec((tm, tk), lambda i, j, k: (i, k)),   # x
                pl.BlockSpec((tk, tn), lambda i, j, k: (k, j)),   # weight [in,out]
                pl.BlockSpec((tk, tn), lambda i, j, k: (k, j)),   # mask   [in,out] int8
                pl.BlockSpec((1, tn), lambda i, j, k: (0, j)),    # bias
            ],
            out_specs=pl.BlockSpec((tm, tn), lambda i, j, k: (i, j)),
            scratch_shapes=[pltpu.VMEM((tm, tn), jnp.float32)],   # f32 accumulator
        ),
        compiler_params=pltpu.CompilerParams(
            dimension_semantics=("parallel", "parallel", "arbitrary"),
        ),
    )(x_p, w_p, m_p, b_p)

    return out_p[:M, :N]


def make_random_mask(key, in_features, out_features, num_true):
    """JAX equivalent of random_mask(rows=in_features, cols=out_features, num_true)."""
    total = in_features * out_features
    values = jnp.arange(total) < num_true          # num_true Trues, rest False
    perm = jax.random.permutation(key, total)
    return values[perm].reshape(in_features, out_features)


def _reference(x, weight, mask, bias):
    return x @ (weight * mask.T.astype(weight.dtype)).T + bias


if __name__ == "__main__":
    key = jax.random.PRNGKey(0)

    # --- Small shapes consistent with the nn.Linear module: batch=4, in=32, out=64.
    batch, in_features, out_features = 4, 32, 64
    percent = 0.5

    k_x, k_w, k_b, k_m = jax.random.split(key, 4)
    bound = 1.0 / (in_features ** 0.5)
    weight = jax.random.uniform(
        k_w, (out_features, in_features), jnp.float32, -bound, bound
    )
    bias = jax.random.uniform(k_b, (out_features,), jnp.float32, -bound, bound)
    mask = make_random_mask(
        k_m, in_features, out_features, int(percent * in_features * out_features)
    )
    x = jax.random.normal(k_x, (batch, in_features), jnp.float32)

    out = jax.block_until_ready(masked_linear(x, weight, mask, bias))
    ref = _reference(x, weight, mask, bias)
    assert out.shape == (batch, out_features)
    assert jnp.allclose(out, ref, atol=1e-5, rtol=1e-5), "mismatch vs reference (small)"

    # --- Second check exercising the multi-block grid + K accumulation path.
    b2, in2, out2 = 256, 384, 512
    k_x2, k_w2, k_b2, k_m2 = jax.random.split(jax.random.PRNGKey(1), 4)
    bound2 = 1.0 / (in2 ** 0.5)
    weight2 = jax.random.uniform(k_w2, (out2, in2), jnp.float32, -bound2, bound2)
    bias2 = jax.random.uniform(k_b2, (out2,), jnp.float32, -bound2, bound2)
    mask2 = make_random_mask(k_m2, in2, out2, int(0.5 * in2 * out2))
    x2 = jax.random.normal(k_x2, (b2, in2), jnp.float32)

    out2_arr = jax.block_until_ready(
        masked_linear(x2, weight2, mask2, bias2, tm=128, tn=128, tk=128)
    )
    ref2 = _reference(x2, weight2, mask2, bias2)
    assert out2_arr.shape == (b2, out2)
    assert jnp.allclose(out2_arr, ref2, atol=1e-4, rtol=1e-4), "mismatch vs reference (tiled)"

    print("KERNEL_OK")
</pallas_src>

<mosaic_0001>
module attributes {stable_mosaic.version = 11 : i64} {
  func.func @_masked_linear_kernel(%arg0: i32, %arg1: i32, %arg2: i32, %arg3: memref<8x128xf32, #tpu.memory_space<vmem>>, %arg4: memref<128x128xf32, #tpu.memory_space<vmem>>, %arg5: memref<128x128xi8, #tpu.memory_space<vmem>>, %arg6: memref<1x128xf32, #tpu.memory_space<vmem>>, %arg7: memref<8x128xf32, #tpu.memory_space<vmem>>, %arg8: memref<8x128xf32, #tpu.memory_space<vmem>>) attributes {dimension_semantics = [#tpu.dimension_semantics<parallel>, #tpu.dimension_semantics<parallel>, #tpu.dimension_semantics<arbitrary>], iteration_bounds = array<i64: 1, 1, 1>, scalar_prefetch = 0 : i64, scratch_operands = 1 : i64, tpu.core_type = #tpu.core_type<tc>, window_params = [{transform_indices = @transform_0, window_bounds = array<i64: 8, 128>}, {transform_indices = @transform_1, window_bounds = array<i64: 128, 128>}, {transform_indices = @transform_2, window_bounds = array<i64: 128, 128>}, {transform_indices = @transform_3, window_bounds = array<i64: 1, 128>}, {transform_indices = @transform_4, window_bounds = array<i64: 8, 128>}]} {
    %c0_i32 = arith.constant 0 : i32
    %0 = arith.cmpi eq, %arg2, %c0_i32 : i32
    %1 = arith.extui %0 : i1 to i32
    %c0_i32_0 = arith.constant 0 : i32
    %2 = arith.cmpi ne, %1, %c0_i32_0 : i32
    scf.if %2 {
      %cst_12 = arith.constant 0.000000e+00 : f32
      %15 = vector.broadcast %cst_12 : f32 to vector<8x128xf32>
      %c0_13 = arith.constant 0 : index
      %c0_14 = arith.constant 0 : index
      %16 = vector.load %arg8[%c0_13, %c0_14] : memref<8x128xf32, #tpu.memory_space<vmem>>, vector<8x128xf32>
      tpu.vector_store %arg8[%c0_13, %c0_14], %15 {strides = array<i32>} : memref<8x128xf32, #tpu.memory_space<vmem>>, vector<8x128xf32>,
    } else {
    }
    %c0 = arith.constant 0 : index
    %c0_1 = arith.constant 0 : index
    %3 = vector.load %arg4[%c0, %c0_1] : memref<128x128xf32, #tpu.memory_space<vmem>>, vector<128x128xf32>
    %c0_2 = arith.constant 0 : index
    %c0_3 = arith.constant 0 : index
    %4 = vector.load %arg5[%c0_2, %c0_3] : memref<128x128xi8, #tpu.memory_space<vmem>>, vector<128x128xi8>
    %5 = arith.sitofp %4 : vector<128x128xi8> to vector<128x128xf32>
    %6 = arith.mulf %3, %5 : vector<128x128xf32>
    %c0_4 = arith.constant 0 : index
    %c0_5 = arith.constant 0 : index
    %7 = vector.load %arg8[%c0_4, %c0_5] : memref<8x128xf32, #tpu.memory_space<vmem>>, vector<8x128xf32>
    %c0_6 = arith.constant 0 : index
    %c0_7 = arith.constant 0 : index
    %8 = vector.load %arg3[%c0_6, %c0_7] : memref<8x128xf32, #tpu.memory_space<vmem>>, vector<8x128xf32>
    %cst = arith.constant dense<0.000000e+00> : vector<8x128xf32>
    %9 = tpu.matmul %8, %6, %cst {dimension_numbers = #tpu.dot_dimension_numbers<[1], [0], [0], [1], [0, 0, 1, 1], [], []>} : vector<8x128xf32>, vector<128x128xf32>, vector<8x128xf32> -> vector<8x128xf32>
    %10 = arith.addf %7, %9 : vector<8x128xf32>
    %c0_8 = arith.constant 0 : index
    %c0_9 = arith.constant 0 : index
    %11 = vector.load %arg8[%c0_8, %c0_9] : memref<8x128xf32, #tpu.memory_space<vmem>>, vector<8x128xf32>
    tpu.vector_store %arg8[%c0_8, %c0_9], %10 {strides = array<i32>} : memref<8x128xf32, #tpu.memory_space<vmem>>, vector<8x128xf32>,
    %c0_i32_10 = arith.constant 0 : i32
    %12 = arith.cmpi eq, %arg2, %c0_i32_10 : i32
    %13 = arith.extui %12 : i1 to i32
    %c0_i32_11 = arith.constant 0 : i32
    %14 = arith.cmpi ne, %13, %c0_i32_11 : i32
    scf.if %14 {
      %c0_12 = arith.constant 0 : index
      %c0_13 = arith.constant 0 : index
      %15 = vector.load %arg8[%c0_12, %c0_13] : memref<8x128xf32, #tpu.memory_space<vmem>>, vector<8x128xf32>
      %c0_14 = arith.constant 0 : index
      %c0_15 = arith.constant 0 : index
      %16 = vector.load %arg6[%c0_14, %c0_15] : memref<1x128xf32, #tpu.memory_space<vmem>>, vector<1x128xf32>
      %17 = vector.broadcast %16 : vector<1x128xf32> to vector<8x128xf32>
      %18 = arith.addf %15, %17 : vector<8x128xf32>
      %c0_16 = arith.constant 0 : index
      %c0_17 = arith.constant 0 : index
      %19 = vector.load %arg7[%c0_16, %c0_17] : memref<8x128xf32, #tpu.memory_space<vmem>>, vector<8x128xf32>
      tpu.vector_store %arg7[%c0_16, %c0_17], %18 {strides = array<i32>} : memref<8x128xf32, #tpu.memory_space<vmem>>, vector<8x128xf32>,
    } else {
    }
    return
  }
  func.func @transform_0(%arg0: i32, %arg1: i32, %arg2: i32) -> (i32, i32) {
    %c0_i32 = arith.constant 0 : i32
    return %arg0, %arg2 : i32, i32
  }
  func.func @transform_1(%arg0: i32, %arg1: i32, %arg2: i32) -> (i32, i32) {
    %c0_i32 = arith.constant 0 : i32
    return %arg2, %arg1 : i32, i32
  }
  func.func @transform_2(%arg0: i32, %arg1: i32, %arg2: i32) -> (i32, i32) {
    %c0_i32 = arith.constant 0 : i32
    return %arg2, %arg1 : i32, i32
  }
  func.func @transform_3(%arg0: i32, %arg1: i32, %arg2: i32) -> (i32, i32) {
    %c0_i32 = arith.constant 0 : i32
    %c0_i32_0 = arith.constant 0 : i32
    return %c0_i32, %arg1 : i32, i32
  }
  func.func @transform_4(%arg0: i32, %arg1: i32, %arg2: i32) -> (i32, i32) {
    %c0_i32 = arith.constant 0 : i32
    return %arg0, %arg1 : i32, i32
  }
}

</mosaic_0001>

<bundles_post_ra>
// kernel: masked_linear.1
= control target key start
LH: loop header
LB: loop body
LE: loop exit
PB: predicated region body
PF: predicated region fallthrough
CT: control target
= control target key end

     0   :  { %s223_s1 = inlined_call_operand.vmem [shape: f32[128,128], index: 1, kind: input, shape index: {}]   ;;  %s224_s2 = inlined_call_operand.vmem [shape: s8[128,128], index: 2, kind: input, shape index: {}]   ;;  %s225_s3 = inlined_call_operand.vmem [shape: f32[1,128], index: 3, kind: input, shape index: {}]   ;;  %s226_s0 = inlined_call_operand.vmem [shape: f32[8,128], index: 0, kind: input, shape index: {}]   ;;  %s227_s4 = inlined_call_operand.vmem [shape: f32[8,128], index: 4, kind: output, shape index: {}]  }
   0x1   :  { %v41_v0 = vld [vmem:[%s224_s2 + $0x18] sm:$0xff]  ;;  %v36_v6 = vld [vmem:[%s223_s1 + $0x70] sm:$0xff]  ;;  %v35_v11 = vld [vmem:[%s223_s1 + $0x68] sm:$0xff] }
   0x2   :  { %v57_v1 = vunpack.c.3.s8 %v41_v0  ;;  %v56_v2 = vunpack.c.2.s8 %v41_v0  ;;  %v55_v3 = vunpack.c.1.s8 %v41_v0  ;;  %v54_v4 = vunpack.c.0.s8 %v41_v0  ;;  %v37_v5 = vld [vmem:[%s223_s1 + $0x78] sm:$0xff]  ;;  %v40_v7 = vld [vmem:[%s224_s2 + $0x10] sm:$0xff]  ;;  %v34_v17 = vld [vmem:[%s223_s1 + $0x60] sm:$0xff] }
   0x3   :  { %v53_v12 = vunpack.c.3.s8 %v40_v7  ;;  %v52_v16 = vunpack.c.2.s8 %v40_v7  ;;  %v51_v20 = vunpack.c.1.s8 %v40_v7  ;;  %v33_v21 = vld [vmem:[%s223_s1 + $0x58] sm:$0xff]  ;;  %v39_v22 = vld [vmem:[%s224_s2 + $0x8] sm:$0xff]  ;;  %v50_v25 = vunpack.c.0.s8 %v40_v7  ;;  %v32_v26 = vld [vmem:[%s223_s1 + $0x50] sm:$0xff] }
   0x4   :  { %v73_v8 = vcvt.s32.f32 %v57_v1  ;;  %v72_v9 = vcvt.s32.f32 %v56_v2  ;;  %v71_v10 = vcvt.s32.f32 %v55_v3  ;;  %v70_v15 = vcvt.s32.f32 %v54_v4  ;;  %v31_v30 = vld [vmem:[%s223_s1 + $0x48] sm:$0xff]  ;;  %v30_v34 = vld [vmem:[%s223_s1 + $0x40] sm:$0xff]  ;;  %v29_v38 = vld [vmem:[%s223_s1 + $0x38] sm:$0xff] }
   0x5   :  { %v69_v19 = vcvt.s32.f32 %v53_v12  ;;  %v68_v24 = vcvt.s32.f32 %v52_v16  ;;  %v67_v28 = vcvt.s32.f32 %v51_v20  ;;  %v49_v29 = vunpack.c.3.s8 %v39_v22  ;;  %v38_v39 = vld [vmem:[%s224_s2] sm:$0xff]  ;;  %v28_v43 = vld [vmem:[%s223_s1 + $0x30] sm:$0xff]  ;;  %v27_v47 = vld [vmem:[%s223_s1 + $0x28] sm:$0xff] }
   0x6   :  { %v89_v13 = vmul.f32 %v73_v8, %v37_v5  ;;  %v88_v14 = vmul.f32 %v72_v9, %v36_v6  ;;  %v87_v18 = vmul.f32 %v71_v10, %v35_v11  ;;  %v86_v23 = vmul.f32 %v70_v15, %v34_v17  ;;  %v26_v51 = vld [vmem:[%s223_s1 + $0x20] sm:$0xff]  ;;  %v25_v55 = vld [vmem:[%s223_s1 + $0x18] sm:$0xff]  ;;  %v24_v59 = vld [vmem:[%s223_s1 + $0x10] sm:$0xff] }
   0x7   :  { %v85_v27 = vmul.f32 %v69_v19, %v33_v21  ;;  %v84_v31 = vmul.f32 %v68_v24, %v32_v26  ;;  %v66_v32 = vcvt.s32.f32 %v50_v25  ;;  %v48_v33 = vunpack.c.2.s8 %v39_v22  ;;  %v23_v62 = vld [vmem:[%s223_s1 + $0x8] sm:$0xff]  ;;  %v22_v1 = vld [vmem:[%s223_s1] sm:$0xff] }
   0x8   :  { %92 = vmatpush.msra.mxu0 %v89_v13  ;;  %v83_v35 = vmul.f32 %v67_v28, %v31_v30  ;;  %v65_v36 = vcvt.s32.f32 %v49_v29  ;;  %v47_v37 = vunpack.c.1.s8 %v39_v22  ;;  %v46_v42 = vunpack.c.0.s8 %v39_v22  ;;  %v91_v4 = vld [vmem:[%s226_s0] sm:$0xff] }
   0x9   :  { %v82_v40 = vmul.f32 %v66_v32, %v30_v34  ;;  %v64_v41 = vcvt.s32.f32 %v48_v33  ;;  %v45_v46 = vunpack.c.3.s8 %v38_v39  ;;  %v44_v50 = vunpack.c.2.s8 %v38_v39  ;;  %v128_v5 = vld [vmem:[%s225_s3] ss:$0 sm:$0xff] }
   0xa   :  { %93 = vmatpush.msra.mxu0 %v88_v14  ;;  %v81_v44 = vmul.f32 %v65_v36, %v29_v38  ;;  %v63_v45 = vcvt.s32.f32 %v47_v37  ;;  %v62_v49 = vcvt.s32.f32 %v46_v42  ;;  %v43_v54 = vunpack.c.1.s8 %v38_v39 }
   0xb   :  { %v80_v48 = vmul.f32 %v64_v41, %v28_v43  ;;  %v61_v53 = vcvt.s32.f32 %v45_v46  ;;  %v60_v57 = vcvt.s32.f32 %v44_v50  ;;  %v42_v58 = vunpack.c.0.s8 %v38_v39 }
   0xc   :  { %94 = vmatpush.msra.mxu0 %v87_v18  ;;  %v79_v52 = vmul.f32 %v63_v45, %v27_v47  ;;  %v78_v56 = vmul.f32 %v62_v49, %v26_v51  ;;  %v59_v61 = vcvt.s32.f32 %v43_v54 }
   0xd   :  { %v77_v60 = vmul.f32 %v61_v53, %v25_v55  ;;  %v76_v63 = vmul.f32 %v60_v57, %v24_v59  ;;  %v58_v0 = vcvt.s32.f32 %v42_v58 }
   0xe   :  { %95 = vmatpush.msra.mxu0 %v86_v23  ;;  %v75_v2 = vmul.f32 %v59_v61, %v23_v62 }
   0xf   :  { %v74_v3 = vmul.f32 %v58_v0, %v22_v1 }
  0x10   :  { %96 = vmatpush.msra.mxu0 %v85_v27 }
  0x12   :  { %97 = vmatpush.msra.mxu0 %v84_v31 }
  0x14   :  { %98 = vmatpush.msra.mxu0 %v83_v35 }
  0x16   :  { %99 = vmatpush.msra.mxu0 %v82_v40 }
  0x18   :  { %100 = vmatpush.msra.mxu0 %v81_v44 }
  0x1a   :  { %101 = vmatpush.msra.mxu0 %v80_v48 }
  0x1c   :  { %102 = vmatpush.msra.mxu0 %v79_v52 }
  0x1e   :  { %103 = vmatpush.msra.mxu0 %v78_v56 }
  0x20   :  { %104 = vmatpush.msra.mxu0 %v77_v60 }
  0x22   :  { %105 = vmatpush.msra.mxu0 %v76_v63 }
  0x24   :  { %106 = vmatpush.msra.mxu0 %v75_v2 }
  0x26   :  { %107 = vmatpush.msra.mxu0 %v74_v3 }
  0x27   :  { %108 = vmatmul.f32.vlgmr.msra.gmra.mxu0 %v91_v4 }
  0xa4   :  { %v109_v6 = vpop.f32.mrf.mxu0 }
  0xa5   :  { %v122_v7 = vadd.f32 %v128_v5, %v109_v6 }
  0xa7   :  { %123 = vst [vmem:[%s227_s4] sm:$0xff] %v122_v7 }

</bundles_post_ra>
